<compile_context>
chip_gen: v7x
topology: tpu7x:2x2x1
jax: 0.10.0
libtpu: 0.0.40
codegen_flags: <defaults>
</compile_context>

<pallas_src>
import functools

import jax
import jax.numpy as jnp
from jax.experimental import pallas as pl
from jax.experimental.pallas import tpu as pltpu

_NEG_LARGE = -3.0e38  # effectively -inf for f32 max tracking (avoids inf-inf NaNs)


def _round_up(x, m):
    return ((x + m - 1) // m) * m


# ----------------------------------------------------------------------------
# Kernel A: node projection + per-head attention scores (grid over node tiles)
#   proj  = x @ W_proj^T                (Np, H*F)
#   s_src = proj @ Ssrc  (== sum_f proj[:,h,f] * a_src[h,f])   (Np, H)
#   s_trg = proj @ Strg                                         (Np, H)
# ----------------------------------------------------------------------------
def _node_proj_kernel(x_ref, wproj_ref, amat_src_ref, amat_trg_ref,
                      proj_ref, ssrc_ref, strg_ref):
    proj = jnp.dot(x_ref[...], wproj_ref[...], preferred_element_type=jnp.float32)
    proj_ref[...] = proj
    ssrc_ref[...] = jnp.dot(proj, amat_src_ref[...], preferred_element_type=jnp.float32)
    strg_ref[...] = jnp.dot(proj, amat_trg_ref[...], preferred_element_type=jnp.float32)


# ----------------------------------------------------------------------------
# Kernel B: fused edge attention + aggregation + skip/concat-or-mean/bias/ELU
# (grid over edge tiles, flash-attention-style online global max; accumulators
#  l=(Np,H) softmax denominators and acc=(Np,H*F) weighted sums live in VMEM)
# ----------------------------------------------------------------------------
def _edge_attention_kernel(gsrc_ref, gtrg_ref, gtrg_t_ref, eprob_ref, emask_ref,
                           ssrc_ref, strg_ref, ctp_ref, proj_ref, emat_ref,
                           infeat_ref, wskip_ref, comb_ref, bias_ref,
                           out_ref, m_sc, l_sc, acc_sc, *, apply_elu):
    step = pl.program_id(0)

    @pl.when(step == 0)
    def _():
        m_sc[...] = jnp.full((1, 1), _NEG_LARGE, jnp.float32)
        l_sc[...] = jnp.zeros_like(l_sc)
        acc_sc[...] = jnp.zeros_like(acc_sc)

    gsrc = gsrc_ref[...]          # (TE, Np) one-hot of source node per edge
    gtrg = gtrg_ref[...]          # (TE, Np) one-hot of target node per edge
    mask = emask_ref[...]         # (TE, 1)  1.0 for real edges, 0.0 for padding

    # scores_per_edge = LeakyReLU_0.2(s_src[src] + s_trg[trg] + edge_prob * c_tp)
    s = jnp.dot(gsrc, ssrc_ref[...], preferred_element_type=jnp.float32)
    s = s + jnp.dot(gtrg, strg_ref[...], preferred_element_type=jnp.float32)
    s = s + eprob_ref[...] * ctp_ref[...]                  # (TE,1)*(1,H) -> (TE,H)
    s = jnp.where(s >= 0.0, s, 0.2 * s)

    # running global max (exactly equivalent to torch's `scores - scores.max()`)
    m_old = m_sc[...]                                      # (1, 1)
    m_tile = jnp.max(jnp.where(mask > 0.5, s, _NEG_LARGE))
    m_new = jnp.maximum(m_old, m_tile)
    scale = jnp.exp(m_old - m_new)
    m_sc[...] = m_new

    p = jnp.where(mask > 0.5, jnp.exp(s - m_new), 0.0)     # (TE, H)

    gtrg_t = gtrg_t_ref[...]                               # (Np, TE), pre-transposed
    # neighborhood softmax denominators (scatter-add == one-hot^T matmul)
    l_sc[...] = l_sc[...] * scale + jnp.dot(gtrg_t, p, preferred_element_type=jnp.float32)
    # lifted source features and attention-weighted aggregation
    lifted = jnp.dot(gsrc, proj_ref[...], preferred_element_type=jnp.float32)   # (TE, HF)
    p_full = jnp.dot(p, emat_ref[...], preferred_element_type=jnp.float32)      # (TE, HF)
    acc_sc[...] = acc_sc[...] * scale + jnp.dot(
        gtrg_t, p_full * lifted, preferred_element_type=jnp.float32)

    @pl.when(step == pl.num_programs(0) - 1)
    def _():
        # out[n,h,:] = acc[n,h,:] / (l[n,h] + 1e-16)
        l_full = jnp.dot(l_sc[...] + 1e-16, emat_ref[...],
                         preferred_element_type=jnp.float32)                    # (Np, HF)
        out = acc_sc[...] * pl.reciprocal(l_full, approx=False)
        # skip connection (identity-per-head or skip_proj, both expressed as a matmul)
        out = out + jnp.dot(infeat_ref[...], wskip_ref[...],
                            preferred_element_type=jnp.float32)
        # concat (identity matrix) or mean-over-heads matrix
        out = jnp.dot(out, comb_ref[...], preferred_element_type=jnp.float32)
        out = out + bias_ref[...]
        if apply_elu:
            out = jnp.where(out > 0.0, out, jnp.exp(out) - 1.0)                 # ELU(1.0)
        out_ref[...] = out


# ----------------------------------------------------------------------------
# Kernel C: final embedding gather  out[r, :] = node_emb[x[r], :]
# (one-hot matmul gather, grid over row tiles)
# ----------------------------------------------------------------------------
def _gather_kernel(onehot_ref, emb_ref, out_ref):
    out_ref[...] = jnp.dot(onehot_ref[...], emb_ref[...],
                           preferred_element_type=jnp.float32)


# ----------------------------------------------------------------------------
# Wrappers
# ----------------------------------------------------------------------------
def gat_layer_forward(node_feat, gsrc, gtrg, gtrg_t, eprob_p, emask, lp,
                      *, node_tile=8, edge_tile=128):
    Np, Fin = node_feat.shape
    HF = lp["wproj_t"].shape[1]
    H = lp["ssrc_mat"].shape[1]
    out_dim = lp["comb"].shape[1]
    Ep = gsrc.shape[0]

    proj, s_src, s_trg = pl.pallas_call(
        _node_proj_kernel,
        out_shape=(jax.ShapeDtypeStruct((Np, HF), jnp.float32),
                   jax.ShapeDtypeStruct((Np, H), jnp.float32),
                   jax.ShapeDtypeStruct((Np, H), jnp.float32)),
        grid=(Np // node_tile,),
        in_specs=[pl.BlockSpec((node_tile, Fin), lambda i: (i, 0)),
                  pl.BlockSpec((Fin, HF), lambda i: (0, 0)),
                  pl.BlockSpec((HF, H), lambda i: (0, 0)),
                  pl.BlockSpec((HF, H), lambda i: (0, 0))],
        out_specs=(pl.BlockSpec((node_tile, HF), lambda i: (i, 0)),
                   pl.BlockSpec((node_tile, H), lambda i: (i, 0)),
                   pl.BlockSpec((node_tile, H), lambda i: (i, 0))),
        compiler_params=pltpu.CompilerParams(dimension_semantics=("parallel",)),
    )(node_feat, lp["wproj_t"], lp["ssrc_mat"], lp["strg_mat"])

    out_nodes = pl.pallas_call(
        functools.partial(_edge_attention_kernel, apply_elu=lp["apply_elu"]),
        out_shape=jax.ShapeDtypeStruct((Np, out_dim), jnp.float32),
        grid=(Ep // edge_tile,),
        in_specs=[pl.BlockSpec((edge_tile, Np), lambda e: (e, 0)),   # gsrc
                  pl.BlockSpec((edge_tile, Np), lambda e: (e, 0)),   # gtrg
                  pl.BlockSpec((Np, edge_tile), lambda e: (0, e)),   # gtrg^T
                  pl.BlockSpec((edge_tile, 1), lambda e: (e, 0)),    # edge_prob
                  pl.BlockSpec((edge_tile, 1), lambda e: (e, 0)),    # edge mask
                  pl.BlockSpec((Np, H), lambda e: (0, 0)),           # s_src
                  pl.BlockSpec((Np, H), lambda e: (0, 0)),           # s_trg
                  pl.BlockSpec((1, H), lambda e: (0, 0)),            # c_tp
                  pl.BlockSpec((Np, HF), lambda e: (0, 0)),          # proj
                  pl.BlockSpec((H, HF), lambda e: (0, 0)),           # head expand
                  pl.BlockSpec((Np, Fin), lambda e: (0, 0)),         # input feats
                  pl.BlockSpec((Fin, HF), lambda e: (0, 0)),         # skip matrix
                  pl.BlockSpec((HF, out_dim), lambda e: (0, 0)),     # concat/mean
                  pl.BlockSpec((1, out_dim), lambda e: (0, 0))],     # bias
        out_specs=pl.BlockSpec((Np, out_dim), lambda e: (0, 0)),
        scratch_shapes=[pltpu.VMEM((1, 1), jnp.float32),
                        pltpu.VMEM((Np, H), jnp.float32),
                        pltpu.VMEM((Np, HF), jnp.float32)],
        compiler_params=pltpu.CompilerParams(dimension_semantics=("arbitrary",)),
    )(gsrc, gtrg, gtrg_t, eprob_p, emask,
      s_src, s_trg, lp["ctp"], proj, lp["emat"],
      node_feat, lp["wskip_eff"], lp["comb"], lp["bias2d"])
    return out_nodes


def gat_forward(node_features, edge_index, edge_prob, x, layer_params, d_model,
                *, node_tile=8, edge_tile=128, row_tile=8):
    N, Fin0 = node_features.shape
    E = edge_index.shape[1]
    Np = _round_up(N, node_tile)
    Ep = _round_up(E, edge_tile)

    node_feat = jnp.zeros((Np, Fin0), jnp.float32).at[:N].set(
        node_features.astype(jnp.float32))
    node_ids = jnp.arange(Np, dtype=jnp.int32)
    src, trg = edge_index[0], edge_index[1]
    gsrc = jnp.zeros((Ep, Np), jnp.float32).at[:E].set(
        (src[:, None] == node_ids[None, :]).astype(jnp.float32))
    gtrg = jnp.zeros((Ep, Np), jnp.float32).at[:E].set(
        (trg[:, None] == node_ids[None, :]).astype(jnp.float32))
    gtrg_t = gtrg.T                                   # pre-transposed once, in the wrapper
    eprob_p = jnp.zeros((Ep, 1), jnp.float32).at[:E].set(edge_prob.astype(jnp.float32))
    emask = jnp.zeros((Ep, 1), jnp.float32).at[:E].set(1.0)

    h = node_feat
    for lp in layer_params:
        h = gat_layer_forward(h, gsrc, gtrg, gtrg_t, eprob_p, emask, lp,
                              node_tile=node_tile, edge_tile=edge_tile)

    # final gather: out[b, t] = node_fea_emb[x[b, t]]
    B, T = x.shape
    BT = B * T
    BTp = _round_up(BT, row_tile)
    xf = x.reshape(-1)
    onehot = jnp.zeros((BTp, Np), jnp.float32).at[:BT].set(
        (xf[:, None] == node_ids[None, :]).astype(jnp.float32))
    gathered = pl.pallas_call(
        _gather_kernel,
        out_shape=jax.ShapeDtypeStruct((BTp, d_model), jnp.float32),
        grid=(BTp // row_tile,),
        in_specs=[pl.BlockSpec((row_tile, Np), lambda i: (i, 0)),
                  pl.BlockSpec((Np, d_model), lambda i: (0, 0))],
        out_specs=pl.BlockSpec((row_tile, d_model), lambda i: (i, 0)),
        compiler_params=pltpu.CompilerParams(dimension_semantics=("parallel",)),
    )(onehot, h)
    return gathered[:BT].reshape(B, T, d_model)


# ----------------------------------------------------------------------------
# Parameter construction (torch-layout params -> Pallas-friendly matrices)
# ----------------------------------------------------------------------------
def init_gat_params(key, in_feature, num_heads_per_layer, num_features_per_layer,
                    avg_last=True):
    feats = [in_feature] + list(num_features_per_layer)
    heads = [1] + list(num_heads_per_layer)
    n_layers = len(num_heads_per_layer)
    layers = []
    for i in range(n_layers):
        last = (i == n_layers - 1)
        concat = (not last) or (not avg_last)
        fin = feats[i] * heads[i]
        F, H = feats[i + 1], heads[i + 1]
        HF = H * F
        key, k1, k2, k3, k4, k5, k6, k7 = jax.random.split(key, 8)

        def xav(k, shape, fan_in, fan_out):
            lim = (6.0 / (fan_in + fan_out)) ** 0.5
            return jax.random.uniform(k, shape, minval=-lim, maxval=lim,
                                      dtype=jnp.float32)

        layers.append(dict(
            H=H, F=F, Fin=fin, concat=concat, apply_elu=(not last),
            W_proj=xav(k1, (HF, fin), fin, HF),        # torch layout (out, in)
            W_tp=xav(k2, (HF, 1), 1, HF),
            a_src=xav(k3, (1, H, F), F, H),
            a_trg=xav(k4, (1, H, F), F, H),
            a_tp=xav(k5, (1, H, F), F, H),
            W_skip=xav(k6, (HF, fin), fin, HF),
            # torch zero-inits the bias; use small random values to exercise the add
            bias=0.1 * jax.random.normal(k7, (HF if concat else F,), dtype=jnp.float32),
        ))
    return layers


def prepare_gat_layer(raw):
    H, F, Fin = raw["H"], raw["F"], raw["Fin"]
    HF = H * F
    eyeH = jnp.eye(H, dtype=jnp.float32)
    # block-diagonal scoring matrices: (proj @ Ssrc)[n,h] = sum_f proj[n,h,f]*a_src[h,f]
    ssrc_mat = (raw["a_src"][0][:, :, None] * eyeH[:, None, :]).reshape(HF, H)
    strg_mat = (raw["a_trg"][0][:, :, None] * eyeH[:, None, :]).reshape(HF, H)
    # trans-prob score collapses to edge_prob * c[h] since Linear(1, HF) has no bias
    ctp = (raw["W_tp"][:, 0].reshape(H, F) * raw["a_tp"][0]).sum(axis=1).reshape(1, H)
    emat = jnp.kron(eyeH, jnp.ones((1, F), jnp.float32))          # (H, HF) head expand
    if F == Fin:   # direct skip add, broadcast over heads
        wskip_eff = jnp.tile(jnp.eye(Fin, dtype=jnp.float32), (1, H))
    else:          # skip_proj path; pre-transposed to (Fin, HF)
        wskip_eff = raw["W_skip"].T
    if raw["concat"]:
        comb = jnp.eye(HF, dtype=jnp.float32)
    else:          # mean over heads
        comb = jnp.kron(jnp.ones((H, 1), jnp.float32), jnp.eye(F, dtype=jnp.float32)) / H
    return dict(wproj_t=raw["W_proj"].T, ssrc_mat=ssrc_mat, strg_mat=strg_mat,
                ctp=ctp, emat=emat, wskip_eff=wskip_eff, comb=comb,
                bias2d=raw["bias"].reshape(1, -1), apply_elu=raw["apply_elu"])


# ----------------------------------------------------------------------------
# Pure-JAX reference (mirrors the PyTorch GATLayerImp3 / GAT forward, eval mode)
# ----------------------------------------------------------------------------
def _mm(a, b):
    return jnp.matmul(a, b, precision=jax.lax.Precision.HIGHEST)


def gat_layer_ref(h, edge_index, edge_prob, p):
    N, Fin = h.shape
    H, F = p["H"], p["F"]
    proj = _mm(h, p["W_proj"].T).reshape(N, H, F)
    s_src = (proj * p["a_src"]).sum(-1)
    s_trg = (proj * p["a_trg"]).sum(-1)
    tp_proj = _mm(edge_prob, p["W_tp"].T).reshape(-1, H, F)
    s_tp = (tp_proj * p["a_tp"]).sum(-1)
    src, trg = edge_index[0], edge_index[1]
    scores = s_src[src] + s_trg[trg] + s_tp
    scores = jnp.where(scores >= 0.0, scores, 0.2 * scores)
    scores = scores - jnp.max(scores)
    exp_s = jnp.exp(scores)
    denom = jnp.zeros((N, H), jnp.float32).at[trg].add(exp_s)
    att = exp_s / (denom[trg] + 1e-16)
    lifted = proj[src]
    out = jnp.zeros((N, H, F), jnp.float32).at[trg].add(lifted * att[:, :, None])
    if F == Fin:
        out = out + h[:, None, :]
    else:
        out = out + _mm(h, p["W_skip"].T).reshape(N, H, F)
    out = out.reshape(N, H * F) if p["concat"] else out.mean(axis=1)
    out = out + p["bias"]
    if p["apply_elu"]:
        out = jnp.where(out > 0.0, out, jnp.exp(out) - 1.0)
    return out


def gat_ref(node_features, edge_index, edge_prob, x, raw_layers):
    h = node_features
    for p in raw_layers:
        h = gat_layer_ref(h, edge_index, edge_prob, p)
    return h[x]


# ----------------------------------------------------------------------------
# Main
# ----------------------------------------------------------------------------
if __name__ == "__main__":
    d_model = 32
    in_feature = 16
    num_heads_per_layer = [4, 4]
    num_features_per_layer = [16, 32]     # avg_last=True -> last features == d_model
    N = 24                                 # graph nodes (vocab size)
    E_rand = 150
    B, T = 2, 8

    key = jax.random.PRNGKey(0)
    k_feat, k_src, k_trg, k_prob, k_x, k_par = jax.random.split(key, 6)

    node_features = jax.random.normal(k_feat, (N, in_feature), dtype=jnp.float32)
    src = jax.random.randint(k_src, (E_rand,), 0, N, dtype=jnp.int32)
    trg = jax.random.randint(k_trg, (E_rand,), 0, N, dtype=jnp.int32)
    loops = jnp.arange(N, dtype=jnp.int32)            # self loops
    edge_index = jnp.stack([jnp.concatenate([src, loops]),
                            jnp.concatenate([trg, loops])], axis=0)
    E = edge_index.shape[1]
    edge_prob = jax.random.uniform(k_prob, (E, 1), dtype=jnp.float32)
    x = jax.random.randint(k_x, (B, T), 0, N, dtype=jnp.int32)

    raw_layers = init_gat_params(k_par, in_feature, num_heads_per_layer,
                                 num_features_per_layer, avg_last=True)
    layer_params = [prepare_gat_layer(p) for p in raw_layers]

    out = gat_forward(node_features, edge_index, edge_prob, x, layer_params, d_model)
    out = jax.block_until_ready(out)

    ref = gat_ref(node_features, edge_index, edge_prob, x, raw_layers)
    assert out.shape == (B, T, d_model), f"bad output shape {out.shape}"
    max_err = float(jnp.max(jnp.abs(out - ref)))
    assert jnp.allclose(out, ref, atol=2e-3, rtol=2e-3), f"mismatch, max_err={max_err}"

    print("KERNEL_OK")
</pallas_src>

<mosaic_0001>
module attributes {stable_mosaic.version = 11 : i64} {
  func.func @_node_proj_kernel(%arg0: i32, %arg1: memref<8x16xf32, #tpu.memory_space<vmem>>, %arg2: memref<16x64xf32, #tpu.memory_space<vmem>>, %arg3: memref<64x4xf32, #tpu.memory_space<vmem>>, %arg4: memref<64x4xf32, #tpu.memory_space<vmem>>, %arg5: memref<8x64xf32, #tpu.memory_space<vmem>>, %arg6: memref<8x4xf32, #tpu.memory_space<vmem>>, %arg7: memref<8x4xf32, #tpu.memory_space<vmem>>) attributes {dimension_semantics = [#tpu.dimension_semantics<parallel>], iteration_bounds = array<i64: 3>, scalar_prefetch = 0 : i64, scratch_operands = 0 : i64, tpu.core_type = #tpu.core_type<tc>, window_params = [{transform_indices = @transform_0, window_bounds = array<i64: 8, 16>}, {pipeline_mode = #tpu.pipeline_mode<synchronous>, transform_indices = @transform_1, window_bounds = array<i64: 16, 64>}, {pipeline_mode = #tpu.pipeline_mode<synchronous>, transform_indices = @transform_2, window_bounds = array<i64: 64, 4>}, {pipeline_mode = #tpu.pipeline_mode<synchronous>, transform_indices = @transform_3, window_bounds = array<i64: 64, 4>}, {transform_indices = @transform_4, window_bounds = array<i64: 8, 64>}, {transform_indices = @transform_5, window_bounds = array<i64: 8, 4>}, {transform_indices = @transform_6, window_bounds = array<i64: 8, 4>}]} {
    %c0 = arith.constant 0 : index
    %c0_0 = arith.constant 0 : index
    %0 = vector.load %arg1[%c0, %c0_0] : memref<8x16xf32, #tpu.memory_space<vmem>>, vector<8x16xf32>
    %c0_1 = arith.constant 0 : index
    %c0_2 = arith.constant 0 : index
    %1 = vector.load %arg2[%c0_1, %c0_2] : memref<16x64xf32, #tpu.memory_space<vmem>>, vector<16x64xf32>
    %cst = arith.constant dense<0.000000e+00> : vector<8x64xf32>
    %2 = tpu.matmul %0, %1, %cst {dimension_numbers = #tpu.dot_dimension_numbers<[1], [0], [0], [1], [0, 0, 1, 1], [], []>} : vector<8x16xf32>, vector<16x64xf32>, vector<8x64xf32> -> vector<8x64xf32>
    %c0_3 = arith.constant 0 : index
    %c0_4 = arith.constant 0 : index
    %3 = vector.load %arg5[%c0_3, %c0_4] : memref<8x64xf32, #tpu.memory_space<vmem>>, vector<8x64xf32>
    tpu.vector_store %arg5[%c0_3, %c0_4], %2 {strides = array<i32>} : memref<8x64xf32, #tpu.memory_space<vmem>>, vector<8x64xf32>,
    %c0_5 = arith.constant 0 : index
    %c0_6 = arith.constant 0 : index
    %4 = vector.load %arg3[%c0_5, %c0_6] : memref<64x4xf32, #tpu.memory_space<vmem>>, vector<64x4xf32>
    %cst_7 = arith.constant dense<0.000000e+00> : vector<8x4xf32>
    %5 = tpu.matmul %2, %4, %cst_7 {dimension_numbers = #tpu.dot_dimension_numbers<[1], [0], [0], [1], [0, 0, 1, 1], [], []>} : vector<8x64xf32>, vector<64x4xf32>, vector<8x4xf32> -> vector<8x4xf32>
    %c0_8 = arith.constant 0 : index
    %c0_9 = arith.constant 0 : index
    %6 = vector.load %arg6[%c0_8, %c0_9] : memref<8x4xf32, #tpu.memory_space<vmem>>, vector<8x4xf32>
    tpu.vector_store %arg6[%c0_8, %c0_9], %5 {strides = array<i32>} : memref<8x4xf32, #tpu.memory_space<vmem>>, vector<8x4xf32>,
    %c0_10 = arith.constant 0 : index
    %c0_11 = arith.constant 0 : index
    %7 = vector.load %arg4[%c0_10, %c0_11] : memref<64x4xf32, #tpu.memory_space<vmem>>, vector<64x4xf32>
    %cst_12 = arith.constant dense<0.000000e+00> : vector<8x4xf32>
    %8 = tpu.matmul %2, %7, %cst_12 {dimension_numbers = #tpu.dot_dimension_numbers<[1], [0], [0], [1], [0, 0, 1, 1], [], []>} : vector<8x64xf32>, vector<64x4xf32>, vector<8x4xf32> -> vector<8x4xf32>
    %c0_13 = arith.constant 0 : index
    %c0_14 = arith.constant 0 : index
    %9 = vector.load %arg7[%c0_13, %c0_14] : memref<8x4xf32, #tpu.memory_space<vmem>>, vector<8x4xf32>
    tpu.vector_store %arg7[%c0_13, %c0_14], %8 {strides = array<i32>} : memref<8x4xf32, #tpu.memory_space<vmem>>, vector<8x4xf32>,
    return
  }
  func.func @transform_0(%arg0: i32) -> (i32, i32) {
    %c0_i32 = arith.constant 0 : i32
    %c0_i32_0 = arith.constant 0 : i32
    return %arg0, %c0_i32 : i32, i32
  }
  func.func @transform_1(%arg0: i32) -> (i32, i32) {
    %c0_i32 = arith.constant 0 : i32
    %c0_i32_0 = arith.constant 0 : i32
    %c0_i32_1 = arith.constant 0 : i32
    return %c0_i32, %c0_i32_0 : i32, i32
  }
  func.func @transform_2(%arg0: i32) -> (i32, i32) {
    %c0_i32 = arith.constant 0 : i32
    %c0_i32_0 = arith.constant 0 : i32
    %c0_i32_1 = arith.constant 0 : i32
    return %c0_i32, %c0_i32_0 : i32, i32
  }
  func.func @transform_3(%arg0: i32) -> (i32, i32) {
    %c0_i32 = arith.constant 0 : i32
    %c0_i32_0 = arith.constant 0 : i32
    %c0_i32_1 = arith.constant 0 : i32
    return %c0_i32, %c0_i32_0 : i32, i32
  }
  func.func @transform_4(%arg0: i32) -> (i32, i32) {
    %c0_i32 = arith.constant 0 : i32
    %c0_i32_0 = arith.constant 0 : i32
    return %arg0, %c0_i32 : i32, i32
  }
  func.func @transform_5(%arg0: i32) -> (i32, i32) {
    %c0_i32 = arith.constant 0 : i32
    %c0_i32_0 = arith.constant 0 : i32
    return %arg0, %c0_i32 : i32, i32
  }
  func.func @transform_6(%arg0: i32) -> (i32, i32) {
    %c0_i32 = arith.constant 0 : i32
    %c0_i32_0 = arith.constant 0 : i32
    return %arg0, %c0_i32 : i32, i32
  }
}

</mosaic_0001>

<bundles_post_ra>
// kernel: tpu_custom_call.1
= control target key start
LH: loop header
LB: loop body
LE: loop exit
PB: predicated region body
PF: predicated region fallthrough
CT: control target
= control target key end

     0   :  { %12 = vsyncpa [#allocation3], 0  ;;  %s1059_s0 = inlined_call_operand.vmem [shape: f32[24,16], index: 0, kind: input, shape index: {}]   ;;  %s1060_s1 = inlined_call_operand.vmem [shape: f32[16,64], index: 1, kind: input, shape index: {}]   ;;  %s1061_s2 = inlined_call_operand.vmem [shape: f32[64,4], index: 2, kind: input, shape index: {}]   ;;  %s1062_s3 = inlined_call_operand.vmem [shape: f32[64,4], index: 3, kind: input, shape index: {}]   ;;  %s1063_s4 = inlined_call_operand.hbm [shape: f32[24,64], index: 4, kind: output, shape index: {0}]   ;;  %s1064_s5 = inlined_call_operand.vmem [shape: f32[24,4], index: 5, kind: output, shape index: {1}]   ;;  %s1065_s6 = inlined_call_operand.vmem [shape: f32[24,4], index: 6, kind: output, shape index: {2}]  }
   0x1   :  { %14 = vsyncpa [#allocation3 + $0x1], 0  ;;  %s897_s21 = smov 0   ;;  %s899_s22 = smov 0  }
   0x2   :  { %s901_s23 = smov 0   ;;  %s903_s24 = smov 0  }
   0x3 LB: > { %s918_s25 = sadd.s32 4294967295, %s856_s24   ;;  %s644_s26 = sadd.s32 4294967294, %s856_s24   ;;  %s856_s24 = sphi %s903_s24, %s1071_s24   ;;  %s852_s23 = sphi %s901_s23, %s1070_s23   ;;  %s848_s22 = sphi %s899_s22, %s1069_s22   ;;  %s844_s21 = sphi %s897_s21, %s1068_s21  }
   0x4   : > { %s922_s27 = sadd.s32 1, %s856_s24   ;;  %s116_s28 = sadd.s32 1, %s852_s23 }
   0x5   : > { %s113_s29 = ssub.s32 %s856_s24, %s922_s27  ;;  %p126_p0 = scmp.ne.s32.totalorder %s852_s23, %s848_s22 }
   0x6   : > { %p114_p1 = scmp.eq.s32.totalorder %s113_s29, 0  ;;  %p127_p2 = scmp.eq.s32.totalorder %s918_s25, 2 }
   0x7   : > { %p132_p3 = scmp.ne.s32.totalorder %s848_s22, %s844_s21  ;;  %p133_p4 = scmp.eq.s32.totalorder %s644_s26, 2 }
   0x8   : > { %s933_s30 = scalar_select %p114_p1, %s852_s23, %s116_s28  }
   0x9   : > { %p935_p5 = por %p127_p2, %p126_p0  ;;  %p939_p6 = por %p133_p4, %p132_p3 }
   0xa   : > { %p647_p7 = scmp.ge.s32.totalorder %s856_s24, 1  ;;  %p219_p8 = scmp.lt.s32.totalorder %s856_s24, 4 }
   0xc   : > { %p220_p9 = pnand %p647_p7, %p219_p8 }
   0xd   : > { %v269_v0 = vld [vmem:[%s1060_s1] sm:$0xff] (!%p220_p9)  ;;  %v270_v1 = vld [vmem:[%s1060_s1 + $0x8] sm:$0xff] (!%p220_p9)  ;;  %p256_p10 = scmp.lt.s32.totalorder (!%p220_p9), %s918_s25, 2  ;;  %v858_v2 = vmov (!%p220_p9), 0.0|0.0   ;;  %vm859_vm0 = vmmov (!%p220_p9), 0   ;;  %v860_v4 = vmov (!%p220_p9), 0.0  }
   0xe   : > { %223 = sbr.rel (%p220_p9) target bundleno = 451 (0x1c3), region = 36  ;;  %725 = vmatprep.subr.bf16.mxu0 (!%p220_p9), %v858_v2  ;;  %v726_v3 = vpack.c.bf16 (!%p220_p9), %v270_v1, %v269_v0  ;;  %684 = vmatprep.mubr.msk.f32.mxu0 (!%p220_p9), %vm859_vm0, %v860_v4  ;;  %v347_v5 = vld [vmem:[%s1061_s2] sm:$0xff] (!%p220_p9)  ;;  %v348_v6 = vld [vmem:[%s1061_s2 + $0x8] sm:$0xff] (!%p220_p9)  ;;  %v349_v10 = vld [vmem:[%s1061_s2 + $0x10] sm:$0xff] (!%p220_p9)  ;;  %vm271_vm1 = vcmask (!%p220_p9), 130048   ;;  %s241_s26 = sand.u32 (!%p220_p9), 1, %s848_s22  }
   0xf   : > { %v430_v7 = vld [vmem:[%s1062_s3] sm:$0xff] (!%p220_p9)  ;;  %728 = vmatprep.subr.bf16.mxu1 (!%p220_p9), %v858_v2  ;;  %v729_v8 = vpack.c.bf16 (!%p220_p9), %v348_v6, %v347_v5  ;;  %v431_v9 = vld [vmem:[%s1062_s3 + $0x8] sm:$0xff] (!%p220_p9)  ;;  %v350_v11 = vld [vmem:[%s1061_s2 + $0x18] sm:$0xff] (!%p220_p9)  ;;  %703 = vmatprep.mubr.msk.f32.mxu1 (!%p220_p9), %vm859_vm0, %v860_v4  ;;  %s648_s28 = sshll.u32 (!%p220_p9), %s241_s26, 3  ;;  %vm345_vm2 = vcmask (!%p220_p9), 523264   ;;  %s656_s9 = sshll.u32 (!%p220_p9), %s918_s25, 7 }
  0x10   : > { %727 = vmatpush3.bf16.msra.mxu0 (!%p220_p9), %v726_v3  ;;  %v741_v12 = vpack.c.bf16 (!%p220_p9), %v431_v9, %v430_v7  ;;  %v732_v13 = vpack.c.bf16 (!%p220_p9), %v350_v11, %v349_v10  ;;  %v432_v14 = vld [vmem:[%s1062_s3 + $0x10] sm:$0xff] (!%p220_p9)  ;;  %v433_v15 = vld [vmem:[%s1062_s3 + $0x18] sm:$0xff] (!%p220_p9)  ;;  %v351_v16 = vld [vmem:[%s1061_s2 + $0x20] sm:$0xff] (!%p220_p9)  ;;  %s243_s29 = scalar_lea.vmem (!%p220_p9), [#allocation2], %s648_s28  ;;  %s1015_s14 = scalar_lea.hbm (!%p220_p9), %s1063_s4, %s656_s9 }
  0x11   : > { %740 = vmatprep.subr.bf16.mxu0 (!%p220_p9), %v858_v2  ;;  %730 = vmatpush3.bf16.msra.mxu1 (!%p220_p9), %v729_v8  ;;  %v352_v17 = vld [vmem:[%s1061_s2 + $0x28] sm:$0xff] (!%p220_p9)  ;;  %v744_v19 = vpack.c.bf16 (!%p220_p9), %v433_v15, %v432_v14  ;;  %v434_v21 = vld [vmem:[%s1062_s3 + $0x20] sm:$0xff] (!%p220_p9)  ;;  %v353_v23 = vld [vmem:[%s1061_s2 + $0x30] sm:$0xff] (!%p220_p9)  ;;  %s531_s10 = sshll.u32 (!%p220_p9), %s243_s29, 4  ;;  %s510_s15 = scalar_lea.sflag (!%p220_p9), [#allocation3], %s241_s26  ;;  %s532_s10 = int_to_ptr.vmem [resolvable:$true] %s531_s10 }
  0x12   : > { %731 = vmatprep.subr.bf16.mxu1 (!%p220_p9), %v858_v2  ;;  %v735_v20 = vpack.c.bf16 (!%p220_p9), %v352_v17, %v351_v16  ;;  %v435_v22 = vld [vmem:[%s1062_s3 + $0x28] sm:$0xff] (!%p220_p9)  ;;  %v354_v24 = vld [vmem:[%s1061_s2 + $0x38] sm:$0xff] (!%p220_p9)  ;;  %v436_v27 = vld [vmem:[%s1062_s3 + $0x30] sm:$0xff] (!%p220_p9)  ;;  %s861_s17 = smov (!%p220_p9), [#allocation2]  }
  0x13   : > { %v747_v25 = vpack.c.bf16 (!%p220_p9), %v435_v22, %v434_v21  ;;  %v738_v26 = vpack.c.bf16 (!%p220_p9), %v354_v24, %v353_v23  ;;  %v437_v28 = vld [vmem:[%s1062_s3 + $0x38] sm:$0xff] (!%p220_p9)  ;;  %s798_s18 = sshll.u32 (!%p220_p9), %s861_s17, 4  ;;  %s799_s18 = int_to_ptr.vmem [resolvable:$false] %s798_s18 }
  0x14   : > { %v750_v29 = vpack.c.bf16 (!%p220_p9), %v437_v28, %v436_v27  ;;  %p801_p0 = scmp.lt.s32.totalorder (!%p220_p9), %s532_s10, %s799_s18 }
  0x15   : > { %s257_s19 = scalar_select %p256_p10, %s918_s25, 2  ;;  %733 = vmatpush3.bf16.msra.mxu1 %v732_v13 }
  0x16   : > { %734 = vmatprep.subr.bf16.mxu1 %v858_v2 }
  0x17   : > { %s973_s11 = sshll.u32 %s257_s19, 3  ;;  %s800_s19 = scalar_lea.vmem %s799_s18, 256 }
  0x18   : > { %s259_s16 = scalar_lea.vmem %s1059_s0, %s973_s11 }
  0x19   : > { %v268_v18 = vld [vmem:[%s259_s16] sm:$0xff]  ;;  %736 = vmatpush3.bf16.msra.mxu1 %v735_v20  ;;  %s794_s16 = scalar_lea.vmem %s532_s10, 128 }
  0x1a   : > { %685 = vmatmul.mubr.msk.f32.vlgmr.msra.gmra.mrb[0].mxu0 %vm271_vm1, %v268_v18  ;;  %737 = vmatprep.subr.bf16.mxu1 %v858_v2  ;;  %p795_p11 = scmp.ne.s32.totalorder %s532_s10, %s794_s16  ;;  %p802_p1 = scmp.lt.s32.totalorder %s800_s19, %s794_s16 }
  0x1b   : > { %742 = vmatpush3.bf16.msra.mxu0 %v741_v12  ;;  %722 = vmatprep.mubr.msk.f32.mxu0 %vm859_vm0, %v860_v4 }
  0x1c   : > { %743 = vmatprep.subr.bf16.mxu0 %v858_v2  ;;  %p796_p12 = pnand %p795_p11, %p935_p5  ;;  %p803_p2 = por %p802_p1, %p801_p0 }
  0x1d   : > { %739 = vmatpush3.bf16.msra.mxu1 %v738_v26 }
  0x1e   : > { %p797_p13 = pneg %p796_p12 }
  0x1f   : > { %745 = vmatpush3.bf16.msra.mxu0 %v744_v19 }
  0x20   : > { %746 = vmatprep.subr.bf16.mxu0 %v858_v2  ;;  %p804_p3 = pnand %p803_p2, %p797_p13 }
  0x23   : > { %748 = vmatpush3.bf16.msra.mxu0 %v747_v25 }
  0x24   : > { %749 = vmatprep.subr.bf16.mxu0 %v858_v2 }
  0x27   : > { %751 = vmatpush3.bf16.msra.mxu0 %v750_v29 }
  0xed   : > { %v341_v30 = vpop.f32.mrb[0].mxu0 }
  0xee   : > { %v686_v31 = vpop.f32.mrb[1].mxu0  ;;  %704 = vmatmul.mubr.msk.f32.vlgmr.msra.gmra.mrb[0].mxu1 %vm345_vm2, %v341_v30  ;;  %723 = vmatmul.mubr.msk.f32.vlgmr.msra.gmra.mrb[2].mxu0 %vm345_vm2, %v341_v30  ;;  %346 = vst.msk [vmem:[%s243_s29] sm:$0xff] %vm345_vm2, %v341_v30 }
  0xef   : > { %807 = shalt.err (!%p804_p3)
}
  0xf0   : > { %s808_s25 = scalar_lea.hbm %s1015_s14, 128  ;;  %s812_s28 = scalar_lea.hbm %s1063_s4, 384 }
  0xf1   : > { %p809_p4 = scmp.ne.s32.totalorder %s1015_s14, %s808_s25  ;;  %p813_p9 = scmp.lt.u32.totalorder %s1015_s14, %s1063_s4 }
  0xf2   : > { %p814_p10 = scmp.lt.u32.totalorder %s812_s28, %s808_s25  ;;  %p816_p12 = scmp.lt.u32.totalorder %s808_s25, %s1015_s14 }
  0xf3   : > { %p810_p7 = pnand %p809_p4, %p935_p5 }
  0xf4   : > { %p815_p11 = por %p814_p10, %p813_p9 }
  0xf5   : > { %p811_p8 = pneg %p810_p7 }
  0xf6   : > { %p817_p13 = por %p816_p12, %p815_p11 }
  0xf8   : > { %p818_p0 = pnand %p817_p13, %p811_p8 }
  0xfa   : > { %821 = shalt.err (!%p818_p0)
}
  0xfb   : > { %752 = dma.vmem_to_hbm [thread:$0]  (%p935_p5), %s532_s10, 128, %s1015_s14, %s510_s15   ;;  %vm428_vm3 = vcmask 31744  }
  0xfc   : > { %s263_s16 = scalar_lea.vmem %s1064_s5, %s973_s11  ;;  %s267_s19 = scalar_lea.vmem %s1065_s6, %s973_s11 }
 0x1c1   : > { %v424_v32 = vpop.f32.mrb[0].mxu1  ;;  %v504_v33 = vpop.f32.mrb[2].mxu0 }
 0x1c2   : > { %429 = vst.msk [vmem:[%s263_s16] sm:$0xff] %vm428_vm3, %v424_v32  ;;  %508 = vst.msk [vmem:[%s267_s19] sm:$0xff] %vm428_vm3, %v504_v33  ;;  %v705_v34 = vpop.f32.mrb[1].mxu1  ;;  %v724_v35 = vpop.f32.mrb[3].mxu0 }
 0x1c3 PF: > { %p758_p5 = scmp.ge.s32.totalorder %s856_s24, 2  ;;  %s549_s7 = sand.u32 1, %s844_s21  }
 0x1c4   : > { %s550_s10 = scalar_lea.sflag [#allocation3], %s549_s7 }
 0x1c5   : > { %p755_p1 = pnand %p758_p5, %p939_p6 }
 0x1c7   : > { %839 = dma.done.wait (!%p755_p1), %s550_s10, 128  }
 0x1c8   : > { %841 = vsyncadd (!%p755_p1), %s550_s10, 4294967168  ;;  %p17_p2 = scmp.ge.s32.totalorder %s922_s27, 5   ;;  %s1068_s21 = smov %s848_s22 }
 0x1c9   : > { %s1069_s22 = smov %s852_s23  ;;  %s1070_s23 = smov %s933_s30 }
 0x1ca   : > { %s1071_s24 = smov %s922_s27  ;;  %19 = sbr.rel (!%p17_p2) target bundleno = 3 (0x3), region = 95 }
 0x1d1   :  { %569 = vsyncpa [#allocation3], 1 }
 0x1d2   :  { %571 = vsyncpa [#allocation3 + $0x1], 1 }

</bundles_post_ra>
